<compile_context>
chip_gen: v6e
topology: v6e:2x2x1
jax: 0.10.0
libtpu: 0.0.40
codegen_flags: <defaults>
</compile_context>

<pallas_src>
import functools

import jax
import jax.numpy as jnp
from jax.experimental import pallas as pl
from jax.experimental.pallas import tpu as pltpu

BN_EPS = 1e-5
LANE = 128  # TPU lane width; output (N) dims of the hidden weights pad to this.

# p_slab row layout (f32, [11, 128]):
#   rows 0..2 : b1, gamma1, beta1
#   rows 3..5 : b2, gamma2, beta2
#   rows 6..8 : b3, gamma3, beta3
#   row  9    : b4 (zero-padded)
#   row 10    : w4[:, 0] (zero-padded) -- used by the binary==1 VPU/XLU head
_P_ROWS = 11


def mlp_decoder_kernel(x_ref, w1_ref, w2_ref, w3_ref, p_ref, *rest,
                       binary, hidden_dim, out_dim):
    if binary == 1:
        (o_ref,) = rest
        w4_ref = None
    else:
        w4_ref, o_ref = rest

    def linear_relu_bn(h_lhs, w_ref_l, row):
        b = p_ref[row + 0:row + 1, :]                       # [1, 128] f32
        g = p_ref[row + 1:row + 2, :]
        be = p_ref[row + 2:row + 3, :]

        # bf16 only at the MXU; accumulate + everything else in f32.
        h = jnp.dot(h_lhs.astype(jnp.bfloat16), w_ref_l[...],
                    preferred_element_type=jnp.float32) + b  # [B, 128] f32
        h = jnp.maximum(h, 0.0)

        # Training-mode BN, centered two-pass variance (no cancellation risk).
        mean = jnp.mean(h, axis=0, keepdims=True)
        c = h - mean
        var = jnp.mean(c * c, axis=0, keepdims=True)
        scale = g * jax.lax.rsqrt(var + BN_EPS)              # EUP rsqrt, VPU mul
        return c * scale + be                                # one multiply-add

    h = linear_relu_bn(x_ref[...], w1_ref, 0)                # useful lanes :hidden_dim
    h = linear_relu_bn(h[:, :hidden_dim], w2_ref, 3)         # useful lanes :hidden_dim
    h = linear_relu_bn(h[:, :hidden_dim], w3_ref, 6)         # useful lanes :out_dim

    b4 = p_ref[9:10, :]                                      # [1, 128]
    if binary == 1:
        # VPU/XLU head: broadcast-multiply by w4^T row (zero past out_dim) and
        # lane-reduce; avoids an MXU push/drain for a single output column.
        w4t = p_ref[10:11, :]                                # [1, 128] f32
        col = jnp.sum(h * w4t, axis=-1, keepdims=True)       # [B, 1]
        o_ref[...] = col + b4[:, :1]
    else:
        o_ref[...] = (jnp.dot(h[:, :out_dim].astype(jnp.bfloat16), w4_ref[...],
                              preferred_element_type=jnp.float32)
                      + b4[:, :binary])


@functools.partial(jax.jit, static_argnames=("hidden_dim", "out_dim", "binary"))
def mlp_decoder(x, w1, w2, w3, p_slab, w4=None, *, hidden_dim, out_dim, binary=1):
    B, in_dim = x.shape

    kernel = functools.partial(mlp_decoder_kernel, binary=binary,
                               hidden_dim=hidden_dim, out_dim=out_dim)
    vmem = pl.BlockSpec(memory_space=pltpu.MemorySpace.VMEM)

    if binary == 1:
        operands = (x, w1, w2, w3, p_slab)
    else:
        operands = (x, w1, w2, w3, p_slab, w4)

    flops = 2 * B * LANE * (in_dim + 2 * hidden_dim) + (
        2 * B * LANE if binary == 1 else 2 * B * out_dim * binary)
    bytes_in = (x.size * 4 + (w1.size + w2.size + w3.size) * 2 + p_slab.size * 4
                + (0 if binary == 1 else w4.size * 2))
    cost = pl.CostEstimate(flops=flops, transcendentals=3 * LANE,
                           bytes_accessed=bytes_in + B * binary * 4)

    return pl.pallas_call(
        kernel,
        out_shape=jax.ShapeDtypeStruct((B, binary), jnp.float32),
        in_specs=[vmem] * len(operands),
        out_specs=vmem,
        cost_estimate=cost,
    )(*operands)


# ---------------------------------------------------------------------------
# Parameter construction / packing (done once, outside the hot path)
# ---------------------------------------------------------------------------

def init_params(key, in_dim, hidden_dim, out_dim, binary=1):
    """Logical (unpadded) params mirroring PyTorch defaults (uniform +-1/sqrt(fan_in))."""
    def linear(key, fan_in, fan_out):
        kw, kb = jax.random.split(key)
        bound = 1.0 / jnp.sqrt(jnp.float32(fan_in))
        w = jax.random.uniform(kw, (fan_in, fan_out), jnp.float32, -bound, bound)
        b = jax.random.uniform(kb, (fan_out,), jnp.float32, -bound, bound)
        return w, b

    def bn(dim):
        return jnp.ones((dim,), jnp.float32), jnp.zeros((dim,), jnp.float32)

    k1, k2, k3, k4 = jax.random.split(key, 4)
    w1, b1 = linear(k1, in_dim, hidden_dim)
    g1, be1 = bn(hidden_dim)
    w2, b2 = linear(k2, hidden_dim, hidden_dim)
    g2, be2 = bn(hidden_dim)
    w3, b3 = linear(k3, hidden_dim, out_dim)
    g3, be3 = bn(out_dim)
    w4, b4 = linear(k4, out_dim, binary)
    return (w1, b1, g1, be1, w2, b2, g2, be2, w3, b3, g3, be3, w4, b4)


def pack_params(params):
    """Pad only the output (lane) dims to 128, keep K natural, store weights bf16."""
    (w1, b1, g1, be1, w2, b2, g2, be2, w3, b3, g3, be3, w4, b4) = params
    hid = b1.shape[0]
    outd = b3.shape[0]
    binary = b4.shape[0]

    def pad_cols_bf16(w):
        k, n = w.shape
        assert n <= LANE
        return jnp.pad(w, ((0, 0), (0, LANE - n))).astype(jnp.bfloat16)

    def pad_row(v):
        v = v.reshape(-1)
        assert v.shape[0] <= LANE
        return jnp.pad(v, (0, LANE - v.shape[0]))

    w1p = pad_cols_bf16(w1)                      # [in_dim, 128]
    w2p = pad_cols_bf16(w2)                      # [hid, 128]
    w3p = pad_cols_bf16(w3)                      # [hid, 128]
    w4p = w4.astype(jnp.bfloat16)                # [outd, binary], only used if binary != 1

    p_rows = [b1, g1, be1, b2, g2, be2, b3, g3, be3, b4, w4[:, 0]]
    p_slab = jnp.stack([pad_row(r) for r in p_rows]).astype(jnp.float32)  # [11, 128]
    assert p_slab.shape == (_P_ROWS, LANE)

    # Packing invariants (review concern): padded lanes must be exactly zero.
    # Defense-in-depth only — the kernel K-slices activations, so padded lanes
    # are never consumed — but keep them exact anyway.
    useful = [hid, hid, hid, hid, hid, hid, outd, outd, outd, binary, outd]
    for i, d in enumerate(useful):
        assert bool(jnp.all(p_slab[i, d:] == 0)), f"p_slab row {i} padding not zero"
    assert bool(jnp.all(w1p[:, hid:] == 0))
    assert bool(jnp.all(w2p[:, hid:] == 0))
    assert bool(jnp.all(w3p[:, outd:] == 0))
    return w1p, w2p, w3p, w4p, p_slab


# ---------------------------------------------------------------------------
# Pure-JAX reference (textbook formulas, training-mode BN)
# ---------------------------------------------------------------------------

def _bn_ref(h, gamma, beta):
    mean = jnp.mean(h, axis=0, keepdims=True)
    var = jnp.mean((h - mean) ** 2, axis=0, keepdims=True)
    return (h - mean) / jnp.sqrt(var + BN_EPS) * gamma + beta


def mlp_decoder_ref(x, params):
    (w1, b1, g1, be1, w2, b2, g2, be2, w3, b3, g3, be3, w4, b4) = params
    h = _bn_ref(jnp.maximum(x @ w1 + b1, 0.0), g1, be1)
    h = _bn_ref(jnp.maximum(h @ w2 + b2, 0.0), g2, be2)
    h = _bn_ref(jnp.maximum(h @ w3 + b3, 0.0), g3, be3)
    return h @ w4 + b4


if __name__ == "__main__":
    B, in_dim, hidden_dim, out_dim, binary = 8, 16, 32, 16, 1

    key = jax.random.PRNGKey(0)
    kx, kp = jax.random.split(key)
    x = jax.random.normal(kx, (B, in_dim), jnp.float32)

    params = init_params(kp, in_dim, hidden_dim, out_dim, binary)
    w1p, w2p, w3p, w4p, p_slab = pack_params(params)  # one-time packing

    out = mlp_decoder(x, w1p, w2p, w3p, p_slab,
                      hidden_dim=hidden_dim, out_dim=out_dim, binary=binary)
    out = jax.block_until_ready(out)

    # Reference uses the SAME stored weights the kernel sees (bf16 fc1..fc3
    # dequantized to f32; the binary==1 head uses the full-precision f32 w4
    # column, matching p_slab row 10).  The remaining kernel-vs-ref gap is the
    # in-kernel bf16 cast of the matmul LHS, bounded well below the tolerance.
    deq = lambda w: w.astype(jnp.bfloat16).astype(jnp.float32)
    (w1, b1, g1, be1, w2, b2, g2, be2, w3, b3, g3, be3, w4, b4) = params
    ref_params = (deq(w1), b1, g1, be1, deq(w2), b2, g2, be2,
                  deq(w3), b3, g3, be3, w4, b4)
    ref = mlp_decoder_ref(x, ref_params)

    assert out.shape == (B, binary), out.shape
    assert bool(jnp.all(jnp.isfinite(out)))
    assert jnp.allclose(out, ref, atol=2e-2, rtol=2e-2), (
        f"max abs err = {jnp.max(jnp.abs(out - ref))}"
    )
    print("KERNEL_OK")
</pallas_src>

<mosaic_0001>
module attributes {stable_mosaic.version = 11 : i64} {
  func.func @mlp_decoder_kernel(%arg0: memref<8x16xf32, #tpu.memory_space<vmem>>, %arg1: memref<16x128xbf16, #tpu.memory_space<vmem>>, %arg2: memref<32x128xbf16, #tpu.memory_space<vmem>>, %arg3: memref<32x128xbf16, #tpu.memory_space<vmem>>, %arg4: memref<11x128xf32, #tpu.memory_space<vmem>>, %arg5: memref<8x1xf32, #tpu.memory_space<vmem>>) attributes {dimension_semantics = [], scalar_prefetch = 0 : i64, scratch_operands = 0 : i64, tpu.core_type = #tpu.core_type<tc>} {
    %c0 = arith.constant 0 : index
    %c0_0 = arith.constant 0 : index
    %0 = vector.load %arg0[%c0, %c0_0] : memref<8x16xf32, #tpu.memory_space<vmem>>, vector<8x16xf32>
    %c0_1 = arith.constant 0 : index
    %c0_2 = arith.constant 0 : index
    %1 = vector.load %arg4[%c0_1, %c0_2] : memref<11x128xf32, #tpu.memory_space<vmem>>, vector<1x128xf32>
    %c1 = arith.constant 1 : index
    %c0_3 = arith.constant 0 : index
    %2 = vector.load %arg4[%c1, %c0_3] : memref<11x128xf32, #tpu.memory_space<vmem>>, vector<1x128xf32>
    %c2 = arith.constant 2 : index
    %c0_4 = arith.constant 0 : index
    %3 = vector.load %arg4[%c2, %c0_4] : memref<11x128xf32, #tpu.memory_space<vmem>>, vector<1x128xf32>
    %4 = arith.truncf %0 : vector<8x16xf32> to vector<8x16xbf16>
    %c0_5 = arith.constant 0 : index
    %c0_6 = arith.constant 0 : index
    %5 = vector.load %arg1[%c0_5, %c0_6] : memref<16x128xbf16, #tpu.memory_space<vmem>>, vector<16x128xbf16>
    %cst = arith.constant dense<0.000000e+00> : vector<8x128xf32>
    %6 = tpu.matmul %4, %5, %cst {dimension_numbers = #tpu.dot_dimension_numbers<[1], [0], [0], [1], [0, 0, 1, 1], [], []>} : vector<8x16xbf16>, vector<16x128xbf16>, vector<8x128xf32> -> vector<8x128xf32>
    %7 = vector.broadcast %1 : vector<1x128xf32> to vector<8x128xf32>
    %8 = arith.addf %6, %7 : vector<8x128xf32>
    %cst_7 = arith.constant 0.000000e+00 : f32
    %9 = vector.broadcast %cst_7 : f32 to vector<8x128xf32>
    %10 = arith.maximumf %8, %9 : vector<8x128xf32>
    %cst_8 = arith.constant dense<0.000000e+00> : vector<128xf32>
    %11 = vector.multi_reduction <add>, %10, %cst_8 [0] : vector<8x128xf32> to vector<128xf32>
    %12 = vector.shape_cast %11 : vector<128xf32> to vector<1x128xf32>
    %cst_9 = arith.constant 8.000000e+00 : f32
    %13 = vector.broadcast %cst_9 : f32 to vector<1x128xf32>
    %14 = arith.divf %12, %13 : vector<1x128xf32>
    %15 = vector.broadcast %14 : vector<1x128xf32> to vector<8x128xf32>
    %16 = arith.subf %10, %15 : vector<8x128xf32>
    %17 = arith.mulf %16, %16 : vector<8x128xf32>
    %cst_10 = arith.constant dense<0.000000e+00> : vector<128xf32>
    %18 = vector.multi_reduction <add>, %17, %cst_10 [0] : vector<8x128xf32> to vector<128xf32>
    %19 = vector.shape_cast %18 : vector<128xf32> to vector<1x128xf32>
    %cst_11 = arith.constant 8.000000e+00 : f32
    %20 = vector.broadcast %cst_11 : f32 to vector<1x128xf32>
    %21 = arith.divf %19, %20 : vector<1x128xf32>
    %cst_12 = arith.constant 9.99999974E-6 : f32
    %22 = vector.broadcast %cst_12 : f32 to vector<1x128xf32>
    %23 = arith.addf %21, %22 : vector<1x128xf32>
    %24 = math.rsqrt %23 : vector<1x128xf32>
    %25 = arith.mulf %2, %24 : vector<1x128xf32>
    %26 = vector.broadcast %25 : vector<1x128xf32> to vector<8x128xf32>
    %27 = arith.mulf %16, %26 : vector<8x128xf32>
    %28 = vector.broadcast %3 : vector<1x128xf32> to vector<8x128xf32>
    %29 = arith.addf %27, %28 : vector<8x128xf32>
    %30 = vector.extract_strided_slice %29 {offsets = [0, 0], sizes = [8, 32], strides = [1, 1]} : vector<8x128xf32> to vector<8x32xf32>
    %c3 = arith.constant 3 : index
    %c0_13 = arith.constant 0 : index
    %31 = vector.load %arg4[%c3, %c0_13] : memref<11x128xf32, #tpu.memory_space<vmem>>, vector<1x128xf32>
    %c4 = arith.constant 4 : index
    %c0_14 = arith.constant 0 : index
    %32 = vector.load %arg4[%c4, %c0_14] : memref<11x128xf32, #tpu.memory_space<vmem>>, vector<1x128xf32>
    %c5 = arith.constant 5 : index
    %c0_15 = arith.constant 0 : index
    %33 = vector.load %arg4[%c5, %c0_15] : memref<11x128xf32, #tpu.memory_space<vmem>>, vector<1x128xf32>
    %34 = arith.truncf %30 : vector<8x32xf32> to vector<8x32xbf16>
    %c0_16 = arith.constant 0 : index
    %c0_17 = arith.constant 0 : index
    %35 = vector.load %arg2[%c0_16, %c0_17] : memref<32x128xbf16, #tpu.memory_space<vmem>>, vector<32x128xbf16>
    %cst_18 = arith.constant dense<0.000000e+00> : vector<8x128xf32>
    %36 = tpu.matmul %34, %35, %cst_18 {dimension_numbers = #tpu.dot_dimension_numbers<[1], [0], [0], [1], [0, 0, 1, 1], [], []>} : vector<8x32xbf16>, vector<32x128xbf16>, vector<8x128xf32> -> vector<8x128xf32>
    %37 = vector.broadcast %31 : vector<1x128xf32> to vector<8x128xf32>
    %38 = arith.addf %36, %37 : vector<8x128xf32>
    %cst_19 = arith.constant 0.000000e+00 : f32
    %39 = vector.broadcast %cst_19 : f32 to vector<8x128xf32>
    %40 = arith.maximumf %38, %39 : vector<8x128xf32>
    %cst_20 = arith.constant dense<0.000000e+00> : vector<128xf32>
    %41 = vector.multi_reduction <add>, %40, %cst_20 [0] : vector<8x128xf32> to vector<128xf32>
    %42 = vector.shape_cast %41 : vector<128xf32> to vector<1x128xf32>
    %cst_21 = arith.constant 8.000000e+00 : f32
    %43 = vector.broadcast %cst_21 : f32 to vector<1x128xf32>
    %44 = arith.divf %42, %43 : vector<1x128xf32>
    %45 = vector.broadcast %44 : vector<1x128xf32> to vector<8x128xf32>
    %46 = arith.subf %40, %45 : vector<8x128xf32>
    %47 = arith.mulf %46, %46 : vector<8x128xf32>
    %cst_22 = arith.constant dense<0.000000e+00> : vector<128xf32>
    %48 = vector.multi_reduction <add>, %47, %cst_22 [0] : vector<8x128xf32> to vector<128xf32>
    %49 = vector.shape_cast %48 : vector<128xf32> to vector<1x128xf32>
    %cst_23 = arith.constant 8.000000e+00 : f32
    %50 = vector.broadcast %cst_23 : f32 to vector<1x128xf32>
    %51 = arith.divf %49, %50 : vector<1x128xf32>
    %cst_24 = arith.constant 9.99999974E-6 : f32
    %52 = vector.broadcast %cst_24 : f32 to vector<1x128xf32>
    %53 = arith.addf %51, %52 : vector<1x128xf32>
    %54 = math.rsqrt %53 : vector<1x128xf32>
    %55 = arith.mulf %32, %54 : vector<1x128xf32>
    %56 = vector.broadcast %55 : vector<1x128xf32> to vector<8x128xf32>
    %57 = arith.mulf %46, %56 : vector<8x128xf32>
    %58 = vector.broadcast %33 : vector<1x128xf32> to vector<8x128xf32>
    %59 = arith.addf %57, %58 : vector<8x128xf32>
    %60 = vector.extract_strided_slice %59 {offsets = [0, 0], sizes = [8, 32], strides = [1, 1]} : vector<8x128xf32> to vector<8x32xf32>
    %c6 = arith.constant 6 : index
    %c0_25 = arith.constant 0 : index
    %61 = vector.load %arg4[%c6, %c0_25] : memref<11x128xf32, #tpu.memory_space<vmem>>, vector<1x128xf32>
    %c7 = arith.constant 7 : index
    %c0_26 = arith.constant 0 : index
    %62 = vector.load %arg4[%c7, %c0_26] : memref<11x128xf32, #tpu.memory_space<vmem>>, vector<1x128xf32>
    %c8 = arith.constant 8 : index
    %c0_27 = arith.constant 0 : index
    %63 = vector.load %arg4[%c8, %c0_27] : memref<11x128xf32, #tpu.memory_space<vmem>>, vector<1x128xf32>
    %64 = arith.truncf %60 : vector<8x32xf32> to vector<8x32xbf16>
    %c0_28 = arith.constant 0 : index
    %c0_29 = arith.constant 0 : index
    %65 = vector.load %arg3[%c0_28, %c0_29] : memref<32x128xbf16, #tpu.memory_space<vmem>>, vector<32x128xbf16>
    %cst_30 = arith.constant dense<0.000000e+00> : vector<8x128xf32>
    %66 = tpu.matmul %64, %65, %cst_30 {dimension_numbers = #tpu.dot_dimension_numbers<[1], [0], [0], [1], [0, 0, 1, 1], [], []>} : vector<8x32xbf16>, vector<32x128xbf16>, vector<8x128xf32> -> vector<8x128xf32>
    %67 = vector.broadcast %61 : vector<1x128xf32> to vector<8x128xf32>
    %68 = arith.addf %66, %67 : vector<8x128xf32>
    %cst_31 = arith.constant 0.000000e+00 : f32
    %69 = vector.broadcast %cst_31 : f32 to vector<8x128xf32>
    %70 = arith.maximumf %68, %69 : vector<8x128xf32>
    %cst_32 = arith.constant dense<0.000000e+00> : vector<128xf32>
    %71 = vector.multi_reduction <add>, %70, %cst_32 [0] : vector<8x128xf32> to vector<128xf32>
    %72 = vector.shape_cast %71 : vector<128xf32> to vector<1x128xf32>
    %cst_33 = arith.constant 8.000000e+00 : f32
    %73 = vector.broadcast %cst_33 : f32 to vector<1x128xf32>
    %74 = arith.divf %72, %73 : vector<1x128xf32>
    %75 = vector.broadcast %74 : vector<1x128xf32> to vector<8x128xf32>
    %76 = arith.subf %70, %75 : vector<8x128xf32>
    %77 = arith.mulf %76, %76 : vector<8x128xf32>
    %cst_34 = arith.constant dense<0.000000e+00> : vector<128xf32>
    %78 = vector.multi_reduction <add>, %77, %cst_34 [0] : vector<8x128xf32> to vector<128xf32>
    %79 = vector.shape_cast %78 : vector<128xf32> to vector<1x128xf32>
    %cst_35 = arith.constant 8.000000e+00 : f32
    %80 = vector.broadcast %cst_35 : f32 to vector<1x128xf32>
    %81 = arith.divf %79, %80 : vector<1x128xf32>
    %cst_36 = arith.constant 9.99999974E-6 : f32
    %82 = vector.broadcast %cst_36 : f32 to vector<1x128xf32>
    %83 = arith.addf %81, %82 : vector<1x128xf32>
    %84 = math.rsqrt %83 : vector<1x128xf32>
    %85 = arith.mulf %62, %84 : vector<1x128xf32>
    %86 = vector.broadcast %85 : vector<1x128xf32> to vector<8x128xf32>
    %87 = arith.mulf %76, %86 : vector<8x128xf32>
    %88 = vector.broadcast %63 : vector<1x128xf32> to vector<8x128xf32>
    %89 = arith.addf %87, %88 : vector<8x128xf32>
    %c9 = arith.constant 9 : index
    %c0_37 = arith.constant 0 : index
    %90 = vector.load %arg4[%c9, %c0_37] : memref<11x128xf32, #tpu.memory_space<vmem>>, vector<1x128xf32>
    %c10 = arith.constant 10 : index
    %c0_38 = arith.constant 0 : index
    %91 = vector.load %arg4[%c10, %c0_38] : memref<11x128xf32, #tpu.memory_space<vmem>>, vector<1x128xf32>
    %92 = vector.broadcast %91 : vector<1x128xf32> to vector<8x128xf32>
    %93 = arith.mulf %89, %92 : vector<8x128xf32>
    %cst_39 = arith.constant dense<0.000000e+00> : vector<8xf32>
    %94 = vector.multi_reduction <add>, %93, %cst_39 [1] : vector<8x128xf32> to vector<8xf32>
    %95 = vector.shape_cast %94 : vector<8xf32> to vector<8x1xf32>
    %96 = vector.extract_strided_slice %90 {offsets = [0, 0], sizes = [1, 1], strides = [1, 1]} : vector<1x128xf32> to vector<1x1xf32>
    %97 = vector.broadcast %96 : vector<1x1xf32> to vector<8x1xf32>
    %98 = arith.addf %95, %97 : vector<8x1xf32>
    %c0_40 = arith.constant 0 : index
    %c0_41 = arith.constant 0 : index
    %99 = vector.load %arg5[%c0_40, %c0_41] : memref<8x1xf32, #tpu.memory_space<vmem>>, vector<8x1xf32>
    tpu.vector_store %arg5[%c0_40, %c0_41], %98 {strides = array<i32>} : memref<8x1xf32, #tpu.memory_space<vmem>>, vector<8x1xf32>,
    return
  }
}

</mosaic_0001>

<bundles_post_ra>
// kernel: mlp_decoder.1
= control target key start
LH: loop header
LB: loop body
LE: loop exit
PB: predicated region body
PF: predicated region fallthrough
CT: control target
= control target key end

     0   :  { %10 = vsyncpa [#allocation3], 0  ;;  %s646_s0 = inlined_call_operand.hbm [shape: f32[8,16], index: 0, kind: input, shape index: {}]   ;;  %s647_s1 = inlined_call_operand.hbm [shape: bf16[16,128], index: 1, kind: input, shape index: {}]   ;;  %s648_s2 = inlined_call_operand.hbm [shape: bf16[32,128], index: 2, kind: input, shape index: {}]   ;;  %s649_s3 = inlined_call_operand.hbm [shape: bf16[32,128], index: 3, kind: input, shape index: {}]   ;;  %s650_s4 = inlined_call_operand.hbm [shape: f32[11,128], index: 4, kind: input, shape index: {}]   ;;  %s651_s5 = inlined_call_operand.vmem [shape: f32[8,1], index: 5, kind: output, shape index: {}]  }
   0x1   :  { %11 = vsyncpa [#allocation5], 0 }
   0x2   :  { %12 = vsyncpa [#allocation8], 0  ;;  %s571_s18 = smov [#allocation4]  }
   0x3   :  { %s28_s19 = sshll.u32 %s571_s18, 4  ;;  %s29_s19 = int_to_ptr.vmem [resolvable:$true] %s28_s19 }
   0x4   :  { %s473_s20 = scalar_lea.vmem %s29_s19, 128  ;;  %p478_p1 = scmp.lt.s32.totalorder %s29_s19, %s29_s19 }
   0x5   :  { %p474_p0 = scmp.ne.s32.totalorder %s29_s19, %s473_s20  ;;  %p479_p2 = scmp.lt.s32.totalorder %s473_s20, %s473_s20 }
   0x7   :  { %p480_p3 = por %p479_p2, %p478_p1 }
   0x9   :  { %p481_p4 = pnand %p480_p3, %p474_p0 }
   0xb   :  { %484 = shalt.err (!%p481_p4)
}
   0xc   :  { %s572_s21 = smov 64   ;;  %s573_s22 = smov 4  }
   0xd   :  { %34 = dma.hbm_to_vmem [thread:$0]  %s647_s1, 128, %s29_s19, [#allocation5], %s572_s21, %s572_s21, %s573_s22  }
   0xe   :  { %s574_s25 = smov [#allocation7]   ;;  %s575_s27 = smov [#allocation2]  }
   0xf   :  { %s52_s26 = sshll.u32 %s574_s25, 4  ;;  %s19_s28 = sshll.u32 %s575_s27, 4  ;;  %s53_s26 = int_to_ptr.vmem [resolvable:$true] %s52_s26  ;;  %s20_s28 = int_to_ptr.vmem [resolvable:$true] %s19_s28 }
  0x10   :  { %s493_s29 = scalar_lea.vmem %s53_s26, 256  ;;  %p498_p6 = scmp.lt.s32.totalorder %s53_s26, %s53_s26 }
  0x11   :  { %p494_p5 = scmp.ne.s32.totalorder %s53_s26, %s493_s29  ;;  %p499_p7 = scmp.lt.s32.totalorder %s493_s29, %s493_s29 }
  0x13   :  { %p500_p8 = por %p499_p7, %p498_p6 }
  0x15   :  { %p501_p9 = pnand %p500_p8, %p494_p5 }
  0x17   :  { %504 = shalt.err (!%p501_p9)
}
  0x18   :  { %58 = dma.hbm_to_vmem [thread:$0]  %s649_s3, 256, %s53_s26, [#allocation8], %s572_s21, %s572_s21, %s573_s22  }
  0x19   :  { %s513_s1 = scalar_lea.vmem %s20_s28, 128  ;;  %p518_p11 = scmp.lt.s32.totalorder %s20_s28, %s20_s28 }
  0x1a   :  { %p514_p10 = scmp.ne.s32.totalorder %s20_s28, %s513_s1  ;;  %p519_p12 = scmp.lt.s32.totalorder %s513_s1, %s513_s1 }
  0x1c   :  { %p520_p13 = por %p519_p12, %p518_p11 }
  0x1e   :  { %p521_p0 = pnand %p520_p13, %p514_p10 }
  0x20   :  { %524 = shalt.err (!%p521_p0)
}
  0x21   :  { %22 = dma.hbm_to_vmem [thread:$0]  %s646_s0, 128, %s20_s28, [#allocation3]  }
  0x22   :  { %s576_s9 = smov [#allocation6]   ;;  %s577_s11 = smov [#allocation9]  }
  0x23   :  { %s40_s10 = sshll.u32 %s576_s9, 4  ;;  %s64_s12 = sshll.u32 %s577_s11, 4  ;;  %s41_s10 = int_to_ptr.vmem [resolvable:$true] %s40_s10  ;;  %s65_s12 = int_to_ptr.vmem [resolvable:$true] %s64_s12 }
  0x24   :  { %s533_s13 = scalar_lea.vmem %s41_s10, 256  ;;  %p538_p2 = scmp.lt.s32.totalorder %s41_s10, %s41_s10 }
  0x25   :  { %p534_p1 = scmp.ne.s32.totalorder %s41_s10, %s533_s13  ;;  %p539_p3 = scmp.lt.s32.totalorder %s533_s13, %s533_s13 }
  0x27   :  { %p540_p4 = por %p539_p3, %p538_p2 }
  0x29   :  { %p541_p5 = pnand %p540_p4, %p534_p1 }
  0x2b   :  { %544 = shalt.err (!%p541_p5)
}
  0x2c   :  { %46 = dma.hbm_to_vmem [thread:$0]  %s648_s2, 256, %s41_s10, [#allocation5], %s572_s21, %s572_s21, %s573_s22  }
  0x2d   :  { %s553_s0 = scalar_lea.vmem %s65_s12, 256  ;;  %p558_p7 = scmp.lt.s32.totalorder %s65_s12, %s65_s12 }
  0x2e   :  { %p554_p6 = scmp.ne.s32.totalorder %s65_s12, %s553_s0  ;;  %p559_p8 = scmp.lt.s32.totalorder %s553_s0, %s553_s0 }
  0x30   :  { %p560_p9 = por %p559_p8, %p558_p7 }
  0x32   :  { %p561_p10 = pnand %p560_p9, %p554_p6 }
  0x34   :  { %564 = shalt.err (!%p561_p10)
}
  0x35   :  { %s578_s15 = smov 128   ;;  %s579_s16 = smov 8  }
  0x36   :  { %70 = dma.hbm_to_vmem [thread:$0]  %s650_s4, 256, %s65_s12, [#allocation8], %s578_s15, %s578_s15, %s579_s16  }
  0x37   :  { %565 = dma.done.wait [#allocation3], 128  }
  0x38   :  { %566 = vsyncadd [#allocation3], 4294967168 }
  0x39   :  { %567 = dma.done.wait [#allocation5], 384  }
  0x3a   :  { %568 = vsyncadd [#allocation5], 4294966912 }
  0x3b   :  { %569 = dma.done.wait [#allocation8], 512  }
  0x3c   :  { %570 = vsyncadd [#allocation8], 4294966784  ;;  %v580_v0 = vmov 0.0   ;;  %vm581_vm0 = vmmov 0   ;;  %v454_v1 = vld [vmem:[#allocation4] sm:$0xff]   ;;  %v87_v2 = vld [vmem:[#allocation2] sm:$0xff]  ;;  %v169_v30 = vlaneseq }
  0x3d   :  { %421 = vmatprep.subr.bf16.mxu0 %v580_v0  ;;  %423 = vmatprep.mubr.msk.bf16.mxu0 %vm581_vm0, %v580_v0  ;;  %vm104_vm1 = vcmask 130048   ;;  %v91_v3 = vpack.c.bf16 %v87_v2, %v87_v2  ;;  %v455_v4 = vld [vmem:[#allocation6 + $0x8] sm:$0xff]   ;;  %v456_v5 = vld [vmem:[#allocation6] sm:$0xff]   ;;  %vm203_vm2 = vcmask 261120   ;;  %v457_v41 = vld [vmem:[#allocation7 + $0x8] sm:$0xff]   ;;  %vm388_vm3 = vcmask 7168  }
  0x3e   :  { %427 = vmatprep.subr.bf16.mxu1 %v580_v0  ;;  %431 = vmatprep.mubr.msk.bf16.mxu1 %vm581_vm0, %v580_v0  ;;  %v397_v6 = vld [vmem:[#allocation9] ss:$0 sm:$0xff]  ;;  %v170_v31 = vshrl.u32 %v169_v30, 7  ;;  %v89_v32 = vld [vmem:[#allocation9 + $0x1] sm:$0x1]  ;;  %v458_v42 = vld [vmem:[#allocation7] sm:$0xff]  }
  0x3f   :  { %422 = vmatpush3.bf16.msra.mxu0 %v454_v1  ;;  %428 = vmatpush3.bf16.msra.mxu1 %v455_v4  ;;  %v400_v37 = vld [vmem:[#allocation9 + $0x2] ss:$0 sm:$0xff]  ;;  %v401_v43 = vld [vmem:[#allocation9 + $0x3] ss:$0 sm:$0xff] }
  0x40   :  { %435 = vmatprep.subr.bf16.mxu0 %v580_v0  ;;  %429 = vmatprep.subr.bf16.mxu1 %v580_v0  ;;  %v636_v33 = vsub.s32 0, %v170_v31 }
  0x42   :  { %424 = vmatmul.mubr.msk.bf16.vlgmr.msra.gmra.mxu0 %vm104_vm1, %v91_v3  ;;  %v180_v3 = vld [vmem:[#allocation9 + $0x4] sm:$0x1] }
  0x43   :  { %439 = vmatprep.mubr.msk.bf16.mxu0 %vm581_vm0, %v580_v0  ;;  %430 = vmatpush3.bf16.msra.mxu1 %v456_v5 }
  0x44   :  { %436 = vmatpush3.bf16.msra.mxu0 %v457_v41 }
  0x45   :  { %437 = vmatprep.subr.bf16.mxu0 %v580_v0 }
  0x48   :  { %438 = vmatpush3.bf16.msra.mxu0 %v458_v42  ;;  %v411_v42 = vld [vmem:[#allocation9 + $0xa] ss:$0 sm:$0xff] }
 0x102   :  { %v142_v7 = vpop.f32.mrf.mxu0 }
 0x103   :  { %v143_v8 = vadd.f32 %v397_v6, %v142_v7  ;;  %v405_v7 = vld [vmem:[#allocation9 + $0x5] ss:$0 sm:$0xff] }
 0x104   :  { %v425_v9 = vpop.f32.mrf.mxu0 }
 0x105   :  { %v148_v10 = vmax.f32 %v143_v8, 0.0 }
 0x106   :  { %v145_v11 = vpop.f32.mrf.mxu0 }
 0x107   :  { %v149_v12 = vrot.slane %v148_v10, 4  ;;  %v406_v11 = vld [vmem:[#allocation9 + $0x6] ss:$0 sm:$0xff] }
 0x108   :  { %v426_v13 = vpop.f32.mrf.mxu0 }
 0x109   :  { %v150_v14 = vadd.f32 %v149_v12, %v148_v10 }
 0x10b   :  { %v151_v15 = vrot.slane %v150_v14, 2 }
 0x10d   :  { %v152_v16 = vadd.f32 %v151_v15, %v150_v14 }
 0x10f   :  { %v153_v17 = vrot.slane %v152_v16, 1 }
 0x111   :  { %v154_v18 = vadd.f32 %v153_v17, %v152_v16 }
 0x113   :  { %v156_v19 = vmul.f32 0.125, %v154_v18 }
 0x115   :  { %v157_v20 = vsub.f32 %v148_v10, %v156_v19 }
 0x117   :  { %v158_v21 = vmul.f32 %v157_v20, %v157_v20 }
 0x119   :  { %v159_v22 = vrot.slane %v158_v21, 4 }
 0x11b   :  { %v160_v23 = vadd.f32 %v159_v22, %v158_v21 }
 0x11d   :  { %v161_v24 = vrot.slane %v160_v23, 2 }
 0x11f   :  { %v162_v25 = vadd.f32 %v161_v24, %v160_v23 }
 0x121   :  { %v163_v26 = vrot.slane %v162_v25, 1 }
 0x123   :  { %v164_v27 = vadd.f32 %v163_v26, %v162_v25 }
 0x125   :  { %v165_v28 = vmul.f32 0.125, %v164_v27 }
 0x127   :  { %v166_v29 = vadd.f32 1e-05, %v165_v28 }
 0x129   :  { %459 = vrsqrt.f32 %v166_v29 }
 0x136   :  { %v460_v34 = vpop.eup %459 }
 0x137   :  { %v168_v35 = vmul.f32 %v460_v34, %v89_v32 }
 0x139   :  { %v172_v36 = vrot.slane %v168_v35, %v636_v33 }
 0x13b   :  { %v173_v38 = vmul.f32 %v172_v36, %v157_v20  ;;  %v278_v36 = vld [vmem:[#allocation9 + $0x7] sm:$0x1] }
 0x13d   :  { %v178_v39 = vadd.f32 %v400_v37, %v173_v38 }
 0x13f   :  { %v182_v40 = vpack.c.bf16 %v178_v39, %v178_v39 }
 0x141   :  { %432 = vmatmul.mubr.msk.bf16.vlgmr.msra.gmra.mxu1 %vm203_vm2, %v182_v40  ;;  %v410_v40 = vld [vmem:[#allocation9 + $0x8] ss:$0 sm:$0xff] }
 0x201   :  { %v241_v44 = vpop.f32.mrf.mxu1 }
 0x202   :  { %v242_v45 = vadd.f32 %v401_v43, %v241_v44 }
 0x203   :  { %v433_v46 = vpop.f32.mrf.mxu1 }
 0x204   :  { %v247_v47 = vmax.f32 %v242_v45, 0.0  ;;  %v412_v45 = vld [vmem:[#allocation9 + $0x9] ss:$0 sm:$0xff] }
 0x205   :  { %v244_v48 = vpop.f32.mrf.mxu1 }
 0x206   :  { %v248_v49 = vrot.slane %v247_v47, 4 }
 0x207   :  { %v434_v50 = vpop.f32.mrf.mxu1 }
 0x208   :  { %v249_v51 = vadd.f32 %v248_v49, %v247_v47 }
 0x20a   :  { %v250_v52 = vrot.slane %v249_v51, 2 }
 0x20c   :  { %v251_v53 = vadd.f32 %v250_v52, %v249_v51 }
 0x20e   :  { %v252_v54 = vrot.slane %v251_v53, 1 }
 0x210   :  { %v253_v55 = vadd.f32 %v252_v54, %v251_v53 }
 0x212   :  { %v254_v56 = vmul.f32 0.125, %v253_v55 }
 0x214   :  { %v255_v57 = vsub.f32 %v247_v47, %v254_v56 }
 0x216   :  { %v256_v58 = vmul.f32 %v255_v57, %v255_v57 }
 0x218   :  { %v257_v59 = vrot.slane %v256_v58, 4 }
 0x21a   :  { %v258_v60 = vadd.f32 %v257_v59, %v256_v58 }
 0x21c   :  { %v259_v61 = vrot.slane %v258_v60, 2 }
 0x21e   :  { %v260_v62 = vadd.f32 %v259_v61, %v258_v60 }
 0x220   :  { %v261_v63 = vrot.slane %v260_v62, 1 }
 0x222   :  { %v262_v0 = vadd.f32 %v261_v63, %v260_v62 }
 0x224   :  { %v263_v1 = vmul.f32 0.125, %v262_v0 }
 0x226   :  { %v264_v2 = vadd.f32 1e-05, %v263_v1 }
 0x228   :  { %461 = vrsqrt.f32 %v264_v2 }
 0x235   :  { %v462_v4 = vpop.eup %461 }
 0x236   :  { %v266_v5 = vmul.f32 %v462_v4, %v180_v3 }
 0x238   :  { %v270_v6 = vrot.slane %v266_v5, %v636_v33 }
 0x23a   :  { %v271_v8 = vmul.f32 %v270_v6, %v255_v57 }
 0x23c   :  { %v276_v9 = vadd.f32 %v405_v7, %v271_v8 }
 0x23e   :  { %v280_v10 = vpack.c.bf16 %v276_v9, %v276_v9 }
 0x240   :  { %440 = vmatmul.mubr.msk.bf16.vlgmr.msra.gmra.mxu0 %vm203_vm2, %v280_v10 }
 0x300   :  { %v338_v12 = vpop.f32.mrf.mxu0 }
 0x301   :  { %v339_v13 = vadd.f32 %v406_v11, %v338_v12 }
 0x302   :  { %v441_v14 = vpop.f32.mrf.mxu0 }
 0x303   :  { %v344_v15 = vmax.f32 %v339_v13, 0.0 }
 0x304   :  { %v341_v16 = vpop.f32.mrf.mxu0 }
 0x305   :  { %v345_v17 = vrot.slane %v344_v15, 4 }
 0x306   :  { %v442_v18 = vpop.f32.mrf.mxu0 }
 0x307   :  { %v346_v19 = vadd.f32 %v345_v17, %v344_v15 }
 0x309   :  { %v347_v20 = vrot.slane %v346_v19, 2 }
 0x30b   :  { %v348_v21 = vadd.f32 %v347_v20, %v346_v19 }
 0x30d   :  { %v349_v22 = vrot.slane %v348_v21, 1 }
 0x30f   :  { %v350_v23 = vadd.f32 %v349_v22, %v348_v21 }
 0x311   :  { %v351_v24 = vmul.f32 0.125, %v350_v23 }
 0x313   :  { %v352_v25 = vsub.f32 %v344_v15, %v351_v24 }
 0x315   :  { %v353_v26 = vmul.f32 %v352_v25, %v352_v25 }
 0x317   :  { %v354_v27 = vrot.slane %v353_v26, 4 }
 0x319   :  { %v355_v28 = vadd.f32 %v354_v27, %v353_v26 }
 0x31b   :  { %v356_v29 = vrot.slane %v355_v28, 2 }
 0x31d   :  { %v357_v30 = vadd.f32 %v356_v29, %v355_v28 }
 0x31f   :  { %v358_v31 = vrot.slane %v357_v30, 1 }
 0x321   :  { %v359_v32 = vadd.f32 %v358_v31, %v357_v30 }
 0x323   :  { %v360_v34 = vmul.f32 0.125, %v359_v32 }
 0x325   :  { %v361_v35 = vadd.f32 1e-05, %v360_v34 }
 0x327   :  { %463 = vrsqrt.f32 %v361_v35 }
 0x334   :  { %v464_v37 = vpop.eup %463 }
 0x335   :  { %v363_v38 = vmul.f32 %v464_v37, %v278_v36 }
 0x337   :  { %v367_v39 = vrot.slane %v363_v38, %v636_v33 }
 0x339   :  { %v368_v41 = vmul.f32 %v367_v39, %v352_v25 }
 0x33b   :  { %v373_v43 = vadd.f32 %v410_v40, %v368_v41 }
 0x33d   :  { %v380_v44 = vmul.f32 %v411_v42, %v373_v43 }
 0x33f   :  { %381 = vadd.xlane.f32.xlu0 %v380_v44 }
 0x3c8   :  { %v382_v46 = vpop.xlane.xlu0 %381 }
 0x3c9   :  { %v387_v47 = vadd.f32 %v412_v45, %v382_v46 }
 0x3cb   :  { %389 = vst.msk [vmem:[%s651_s5] sm:$0xff] %vm388_vm3, %v387_v47 }
 0x3cc   :  { %394 = vsyncpa [#allocation3], 1 }
 0x3cd   :  { %395 = vsyncpa [#allocation5], 1 }
 0x3ce   :  { %396 = vsyncpa [#allocation8], 1 }

</bundles_post_ra>
